<compile_context>
chip_gen: v5e
topology: v5e:2x2
jax: 0.10.0
libtpu: 0.0.40
codegen_flags: <defaults>
</compile_context>

<pallas_src>
import functools
import math

import jax
import jax.numpy as jnp
from jax.experimental import pallas as pl
from jax.experimental.pallas import tpu as pltpu


def _round_up(x, m):
    return ((x + m - 1) // m) * m


def _cdiv(a, b):
    return -(-a // b)


def _critic_kernel(x_ref, w1t_ref, b1_ref, w2t_ref, b2_ref, w3_ref, b3_ref,
                   o_ref):
    """Fused 3-layer MLP on one (K_pad, tile_b) batch tile (batch on lanes).

    x_ref  : (K_pad, tile_b)  transposed cat(state, action), zero-padded K
    w1t_ref: (H, K_pad)       fc1 weight, transposed + zero-padded K
    b1_ref : (H, 1)
    w2t_ref: (H, H)           fc2 weight, transposed
    b2_ref : (H, 1)
    w3_ref : (H, 1)           fc3 weight column
    b3_ref : (1, 1)
    o_ref  : (1, tile_b)      lane-dense q row
    """
    # fc1: single merged K=K_pad MXU contraction, f32 accumulation.
    h1 = jnp.dot(w1t_ref[...], x_ref[...],
                 preferred_element_type=jnp.float32) + b1_ref[...]
    h1 = jnp.maximum(h1, 0.0)
    # fc2: (H, H) @ (H, tile_b) on the MXU, f32 accumulation.
    h2 = jnp.dot(w2t_ref[...], h1,
                 preferred_element_type=jnp.float32) + b2_ref[...]
    h2 = jnp.maximum(h2, 0.0)
    # fc3 on VPU/XLU: broadcast-multiply by the w3 column, sublane-reduce over
    # H — keeps the vmatmul slot free for fc1/fc2.
    q = jnp.sum(h2 * w3_ref[...], axis=0, keepdims=True) + b3_ref[...]
    o_ref[...] = q.astype(o_ref.dtype)


@functools.partial(jax.jit, static_argnames=("input_dtype", "max_tile_b"))
def critic_forward(state, action, params, input_dtype="auto", max_tile_b=8192):
    """q = fc3(relu(fc2(relu(fc1([state, action]))))) via a fused Pallas kernel.

    input_dtype:
      "auto"       -> bf16 input streaming for training-sized batches (B>=512),
                      f32 otherwise.
      jnp.bfloat16 -> force bf16 streaming of x / w1 (f32 accumulation kept).
      None / jnp.float32 -> pure f32.
    """
    assert max_tile_b % 128 == 0, "max_tile_b must be a multiple of 128"

    B, S = state.shape
    A = action.shape[1]
    H = params["w2"].shape[0]
    K = S + A
    K_pad = _round_up(K, 8)

    if isinstance(input_dtype, str) and input_dtype == "auto":
        input_dtype = jnp.bfloat16 if B >= 512 else None

    # ---- batch tiling: multiples of 128, >= 2 tiles for medium/large batches
    # (so the "parallel" axis shards across both TensorCores on v7x), tiles
    # capped at max_tile_b. ----
    b_128 = _round_up(max(B, 1), 128)
    if b_128 <= 256:
        tile_b = b_128                          # tiny batch: one tile
    else:
        n_tiles = max(2, _cdiv(b_128, max_tile_b))
        tile_b = _round_up(_cdiv(b_128, n_tiles), 128)
    b_pad = _round_up(B, tile_b)
    num_tiles = b_pad // tile_b

    # ---- layout prep (one fused XLA relayout copy): cat + pad + transpose ----
    w1 = params["w1"]                            # (S + A, H)
    x = jnp.concatenate([state, action], axis=-1)          # (B, K)
    if input_dtype is not None:
        x = x.astype(input_dtype)
        w1 = w1.astype(input_dtype)
    x = jnp.pad(x, ((0, b_pad - B), (0, K_pad - K)))        # zero-pad batch & K
    x_t = x.T                                               # (K_pad, b_pad)

    w1t = jnp.pad(w1, ((0, K_pad - K), (0, 0))).T            # (H, K_pad)
    b1c = params["b1"].reshape(-1, 1)                        # (H, 1)
    w2t = params["w2"].T                                     # (H, H)
    b2c = params["b2"].reshape(-1, 1)                        # (H, 1)
    w3c = params["w3"].reshape(-1, 1)                        # (H, 1)
    b3c = params["b3"].reshape(1, 1)                         # (1, 1)

    # Tiny weights/biases: constant index_maps keep them VMEM-resident across
    # all grid steps.
    resident = lambda a: pl.BlockSpec(a.shape, lambda i: (0,) * a.ndim)

    out = pl.pallas_call(
        _critic_kernel,
        out_shape=jax.ShapeDtypeStruct((1, b_pad), jnp.float32),
        grid=(num_tiles,),
        in_specs=[
            pl.BlockSpec((K_pad, tile_b), lambda i: (0, i)),   # input slab tile
            resident(w1t), resident(b1c),
            resident(w2t), resident(b2c),
            resident(w3c), resident(b3c),
        ],
        out_specs=pl.BlockSpec((1, tile_b), lambda i: (0, i)),
        compiler_params=pltpu.CompilerParams(
            dimension_semantics=("parallel",)),
    )(x_t, w1t, b1c, w2t, b2c, w3c, b3c)

    return out[0, :B][:, None]                   # (B, 1)


def init_critic_params(key, state_size, action_size, hidden_size=32):
    """Deterministic init mirroring Critic.reset_parameters().

    PyTorch's hidden_init uses weight.size()[0] == out_features as 'fan_in',
    so lim = 1/sqrt(out_features) for fc1/fc2; fc3 weights ~ U(-3e-3, 3e-3).
    Biases keep PyTorch's default Linear init: U(-1/sqrt(in_features), ...).
    Weights are stored as (in_features, out_features).
    """
    in1 = state_size + action_size
    k = jax.random.split(key, 6)

    lim1 = 1.0 / math.sqrt(hidden_size)   # hidden_init(fc1)
    lim2 = 1.0 / math.sqrt(hidden_size)   # hidden_init(fc2)
    lim3 = 3e-3

    blim1 = 1.0 / math.sqrt(in1)          # default bias init bounds
    blim2 = 1.0 / math.sqrt(hidden_size)
    blim3 = 1.0 / math.sqrt(hidden_size)

    u = lambda kk, shape, lim: jax.random.uniform(
        kk, shape, dtype=jnp.float32, minval=-lim, maxval=lim)

    return {
        "w1": u(k[0], (in1, hidden_size), lim1),
        "b1": u(k[1], (1, hidden_size), blim1),
        "w2": u(k[2], (hidden_size, hidden_size), lim2),
        "b2": u(k[3], (1, hidden_size), blim2),
        "w3": u(k[4], (hidden_size, 1), lim3),
        "b3": u(k[5], (1, 1), blim3),
    }


def _reference_forward(state, action, params, input_dtype=None):
    """Pure-JAX reference (also the recommended path for tiny batches)."""
    w1 = params["w1"]
    if input_dtype is not None:
        state = state.astype(input_dtype).astype(jnp.float32)
        action = action.astype(input_dtype).astype(jnp.float32)
        w1 = w1.astype(input_dtype).astype(jnp.float32)
    x = jnp.concatenate([state, action], axis=-1)
    h1 = jnp.maximum(x @ w1 + params["b1"], 0.0)
    h2 = jnp.maximum(h1 @ params["w2"] + params["b2"], 0.0)
    return h2 @ params["w3"] + params["b3"]


if __name__ == "__main__":
    # Small shapes consistent with the module: batch=2, state=8, action=4, hidden=32.
    B, STATE, ACTION, HIDDEN = 2, 8, 4, 32

    key = jax.random.PRNGKey(0)
    k_s, k_a, k_p, k_s2, k_a2 = jax.random.split(key, 5)

    params = init_critic_params(k_p, STATE, ACTION, HIDDEN)

    # --- small module-sized batch (auto keeps f32 below B=512) ---
    state = jax.random.normal(k_s, (B, STATE), dtype=jnp.float32)
    action = jax.random.normal(k_a, (B, ACTION), dtype=jnp.float32)
    q = critic_forward(state, action, params)
    jax.block_until_ready(q)
    q_ref = _reference_forward(state, action, params)
    assert q.shape == (B, 1), q.shape
    assert jnp.allclose(q, q_ref, atol=1e-4, rtol=1e-4), (q, q_ref)

    # --- training-sized ragged batch, forced f32: exercises multi-tile grid,
    #     batch padding and the lane-dense output path ---
    B2 = 1030
    state2 = jax.random.normal(k_s2, (B2, STATE), dtype=jnp.float32)
    action2 = jax.random.normal(k_a2, (B2, ACTION), dtype=jnp.float32)
    q2_f32 = critic_forward(state2, action2, params, input_dtype=jnp.float32)
    jax.block_until_ready(q2_f32)
    q2_ref = _reference_forward(state2, action2, params)
    assert q2_f32.shape == (B2, 1), q2_f32.shape
    assert jnp.allclose(q2_f32, q2_ref, atol=1e-4, rtol=1e-4)

    # --- default training-batch path: bf16 input streaming, f32 accumulation ---
    q2 = critic_forward(state2, action2, params)            # auto -> bf16
    jax.block_until_ready(q2)
    q2_bf16_ref = _reference_forward(state2, action2, params,
                                     input_dtype=jnp.bfloat16)
    assert jnp.allclose(q2, q2_bf16_ref, atol=2e-3, rtol=2e-3)
    # bf16 only rounds the streamed inputs; stays close to the f32 reference.
    assert jnp.allclose(q2, q2_ref, atol=5e-2, rtol=5e-2)

    print("KERNEL_OK")
</pallas_src>

<mosaic_0001>
module attributes {stable_mosaic.version = 11 : i64} {
  func.func @_critic_kernel(%arg0: i32, %arg1: memref<16x128xf32, #tpu.memory_space<vmem>>, %arg2: memref<32x16xf32, #tpu.memory_space<vmem>>, %arg3: memref<32x1xf32, #tpu.memory_space<vmem>>, %arg4: memref<32x32xf32, #tpu.memory_space<vmem>>, %arg5: memref<32x1xf32, #tpu.memory_space<vmem>>, %arg6: memref<32x1xf32, #tpu.memory_space<vmem>>, %arg7: memref<1x1xf32, #tpu.memory_space<vmem>>, %arg8: memref<1x128xf32, #tpu.memory_space<vmem>>) attributes {dimension_semantics = [#tpu.dimension_semantics<parallel>], iteration_bounds = array<i64: 1>, scalar_prefetch = 0 : i64, scratch_operands = 0 : i64, tpu.core_type = #tpu.core_type<tc>, window_params = [{transform_indices = @transform_0, window_bounds = array<i64: 16, 128>}, {pipeline_mode = #tpu.pipeline_mode<synchronous>, transform_indices = @transform_1, window_bounds = array<i64: 32, 16>}, {pipeline_mode = #tpu.pipeline_mode<synchronous>, transform_indices = @transform_2, window_bounds = array<i64: 32, 1>}, {pipeline_mode = #tpu.pipeline_mode<synchronous>, transform_indices = @transform_3, window_bounds = array<i64: 32, 32>}, {pipeline_mode = #tpu.pipeline_mode<synchronous>, transform_indices = @transform_4, window_bounds = array<i64: 32, 1>}, {pipeline_mode = #tpu.pipeline_mode<synchronous>, transform_indices = @transform_5, window_bounds = array<i64: 32, 1>}, {pipeline_mode = #tpu.pipeline_mode<synchronous>, transform_indices = @transform_6, window_bounds = array<i64: 1, 1>}, {transform_indices = @transform_7, window_bounds = array<i64: 1, 128>}]} {
    %c0 = arith.constant 0 : index
    %c0_0 = arith.constant 0 : index
    %0 = vector.load %arg2[%c0, %c0_0] : memref<32x16xf32, #tpu.memory_space<vmem>>, vector<32x16xf32>
    %c0_1 = arith.constant 0 : index
    %c0_2 = arith.constant 0 : index
    %1 = vector.load %arg1[%c0_1, %c0_2] : memref<16x128xf32, #tpu.memory_space<vmem>>, vector<16x128xf32>
    %cst = arith.constant dense<0.000000e+00> : vector<32x128xf32>
    %2 = tpu.matmul %0, %1, %cst {dimension_numbers = #tpu.dot_dimension_numbers<[1], [0], [0], [1], [0, 0, 1, 1], [], []>} : vector<32x16xf32>, vector<16x128xf32>, vector<32x128xf32> -> vector<32x128xf32>
    %c0_3 = arith.constant 0 : index
    %c0_4 = arith.constant 0 : index
    %3 = vector.load %arg3[%c0_3, %c0_4] : memref<32x1xf32, #tpu.memory_space<vmem>>, vector<32x1xf32>
    %4 = vector.broadcast %3 : vector<32x1xf32> to vector<32x128xf32>
    %5 = arith.addf %2, %4 : vector<32x128xf32>
    %cst_5 = arith.constant 0.000000e+00 : f32
    %6 = vector.broadcast %cst_5 : f32 to vector<32x128xf32>
    %7 = arith.maximumf %5, %6 : vector<32x128xf32>
    %c0_6 = arith.constant 0 : index
    %c0_7 = arith.constant 0 : index
    %8 = vector.load %arg4[%c0_6, %c0_7] : memref<32x32xf32, #tpu.memory_space<vmem>>, vector<32x32xf32>
    %cst_8 = arith.constant dense<0.000000e+00> : vector<32x128xf32>
    %9 = tpu.matmul %8, %7, %cst_8 {dimension_numbers = #tpu.dot_dimension_numbers<[1], [0], [0], [1], [0, 0, 1, 1], [], []>} : vector<32x32xf32>, vector<32x128xf32>, vector<32x128xf32> -> vector<32x128xf32>
    %c0_9 = arith.constant 0 : index
    %c0_10 = arith.constant 0 : index
    %10 = vector.load %arg5[%c0_9, %c0_10] : memref<32x1xf32, #tpu.memory_space<vmem>>, vector<32x1xf32>
    %11 = vector.broadcast %10 : vector<32x1xf32> to vector<32x128xf32>
    %12 = arith.addf %9, %11 : vector<32x128xf32>
    %cst_11 = arith.constant 0.000000e+00 : f32
    %13 = vector.broadcast %cst_11 : f32 to vector<32x128xf32>
    %14 = arith.maximumf %12, %13 : vector<32x128xf32>
    %c0_12 = arith.constant 0 : index
    %c0_13 = arith.constant 0 : index
    %15 = vector.load %arg6[%c0_12, %c0_13] : memref<32x1xf32, #tpu.memory_space<vmem>>, vector<32x1xf32>
    %16 = vector.broadcast %15 : vector<32x1xf32> to vector<32x128xf32>
    %17 = arith.mulf %14, %16 : vector<32x128xf32>
    %cst_14 = arith.constant dense<0.000000e+00> : vector<128xf32>
    %18 = vector.multi_reduction <add>, %17, %cst_14 [0] : vector<32x128xf32> to vector<128xf32>
    %19 = vector.shape_cast %18 : vector<128xf32> to vector<1x128xf32>
    %c0_15 = arith.constant 0 : index
    %c0_16 = arith.constant 0 : index
    %20 = vector.load %arg7[%c0_15, %c0_16] : memref<1x1xf32, #tpu.memory_space<vmem>>, vector<1x1xf32>
    %21 = vector.broadcast %20 : vector<1x1xf32> to vector<1x128xf32>
    %22 = arith.addf %19, %21 : vector<1x128xf32>
    %c0_17 = arith.constant 0 : index
    %c0_18 = arith.constant 0 : index
    %23 = vector.load %arg8[%c0_17, %c0_18] : memref<1x128xf32, #tpu.memory_space<vmem>>, vector<1x128xf32>
    tpu.vector_store %arg8[%c0_17, %c0_18], %22 {strides = array<i32>} : memref<1x128xf32, #tpu.memory_space<vmem>>, vector<1x128xf32>,
    return
  }
  func.func @transform_0(%arg0: i32) -> (i32, i32) {
    %c0_i32 = arith.constant 0 : i32
    %c0_i32_0 = arith.constant 0 : i32
    return %c0_i32, %arg0 : i32, i32
  }
  func.func @transform_1(%arg0: i32) -> (i32, i32) {
    %c0_i32 = arith.constant 0 : i32
    %c0_i32_0 = arith.constant 0 : i32
    %c0_i32_1 = arith.constant 0 : i32
    return %c0_i32, %c0_i32_0 : i32, i32
  }
  func.func @transform_2(%arg0: i32) -> (i32, i32) {
    %c0_i32 = arith.constant 0 : i32
    %c0_i32_0 = arith.constant 0 : i32
    %c0_i32_1 = arith.constant 0 : i32
    return %c0_i32, %c0_i32_0 : i32, i32
  }
  func.func @transform_3(%arg0: i32) -> (i32, i32) {
    %c0_i32 = arith.constant 0 : i32
    %c0_i32_0 = arith.constant 0 : i32
    %c0_i32_1 = arith.constant 0 : i32
    return %c0_i32, %c0_i32_0 : i32, i32
  }
  func.func @transform_4(%arg0: i32) -> (i32, i32) {
    %c0_i32 = arith.constant 0 : i32
    %c0_i32_0 = arith.constant 0 : i32
    %c0_i32_1 = arith.constant 0 : i32
    return %c0_i32, %c0_i32_0 : i32, i32
  }
  func.func @transform_5(%arg0: i32) -> (i32, i32) {
    %c0_i32 = arith.constant 0 : i32
    %c0_i32_0 = arith.constant 0 : i32
    %c0_i32_1 = arith.constant 0 : i32
    return %c0_i32, %c0_i32_0 : i32, i32
  }
  func.func @transform_6(%arg0: i32) -> (i32, i32) {
    %c0_i32 = arith.constant 0 : i32
    %c0_i32_0 = arith.constant 0 : i32
    %c0_i32_1 = arith.constant 0 : i32
    return %c0_i32, %c0_i32_0 : i32, i32
  }
  func.func @transform_7(%arg0: i32) -> (i32, i32) {
    %c0_i32 = arith.constant 0 : i32
    %c0_i32_0 = arith.constant 0 : i32
    return %c0_i32, %arg0 : i32, i32
  }
}

</mosaic_0001>

<bundles_post_ra>
// kernel: critic_forward.1
= control target key start
LH: loop header
LB: loop body
LE: loop exit
PB: predicated region body
PF: predicated region fallthrough
CT: control target
= control target key end

     0   :  { %v246_v0 = vmov 0   ;;  %vm58_vm0 = vcmask 130048   ;;  %vm132_vm1 = vcmask 261120   ;;  %s363_s2 = inlined_call_operand.vmem [shape: f32[32,1], index: 2, kind: input, shape index: {}]   ;;  %s364_s0 = inlined_call_operand.vmem [shape: f32[16,128], index: 0, kind: input, shape index: {}]   ;;  %s365_s1 = inlined_call_operand.vmem [shape: f32[32,16], index: 1, kind: input, shape index: {}]   ;;  %s366_s6 = inlined_call_operand.<no memory space> [shape: f32[1,1], index: 6, kind: input, shape index: {}]   ;;  %s367_s4 = inlined_call_operand.vmem [shape: f32[32,1], index: 4, kind: input, shape index: {}]   ;;  %s368_s5 = inlined_call_operand.vmem [shape: f32[32,1], index: 5, kind: input, shape index: {}]   ;;  %s369_s3 = inlined_call_operand.vmem [shape: f32[32,32], index: 3, kind: input, shape index: {}]   ;;  %s370_s7 = inlined_call_operand.vmem [shape: f32[1,128], index: 7, kind: output, shape index: {}]  }
   0x1   :  { %243 = vset.pattern.permute.xlu0 %v246_v0  ;;  %v37_v1 = vld [vmem:[%s363_s2 + $0x18] sm:$0xff]  ;;  %v33_v2 = vld [vmem:[%s364_s0 + $0x8] sm:$0xff]  ;;  %v32_v3 = vld [vmem:[%s364_s0] sm:$0xff]  ;;  %244 = vset.pattern.permute.xlu1 %v246_v0  ;;  %v12_v4 = vstv %s366_s6 }
   0x2   :  { %55 = vperm.xlu0 %243, %v37_v1   ;;  %236 = vmatpush.msra.mxu3 %v33_v2  ;;  %v29_v5 = vld [vmem:[%s365_s1 + $0x8] sm:$0xff]  ;;  %13 = vst [vmem:[#allocation2] sm:$0x1] %v12_v4  ;;  %v28_v7 = vld [vmem:[%s365_s1] sm:$0xff]  ;;  %v36_v8 = vld [vmem:[%s363_s2 + $0x10] sm:$0xff] }
   0x3   :  { %v35_v6 = vld [vmem:[%s363_s2 + $0x8] sm:$0xff]  ;;  %85 = vmatpush.msra.mxu0 %v33_v2  ;;  %245 = vset.pattern.permute.xlu2 %v246_v0  ;;  %v34_v9 = vld [vmem:[%s363_s2] sm:$0xff]  ;;  %v30_v10 = vld [vmem:[%s365_s1 + $0x10] sm:$0xff] }
   0x4   :  { %45 = vperm.xlu1 %244, %v35_v6   ;;  %237 = vmatpush.msra.mxu3 %v32_v3  ;;  %v110_v11 = vld [vmem:[%s367_s4 + $0x10] sm:$0xff]  ;;  %v111_v12 = vld [vmem:[%s367_s4 + $0x18] sm:$0xff]  ;;  %v179_v14 = vld [vmem:[%s368_s5 + $0x8] sm:$0xff] }
   0x5   :  { %229 = vmatmul.msk.f32.vlgmr.msra.gmra.mxu3 %vm58_vm0, %v29_v5  ;;  %86 = vmatpush.msra.mxu0 %v32_v3  ;;  %v31_v13 = vld [vmem:[%s365_s1 + $0x18] sm:$0xff]  ;;  %v180_v15 = vld [vmem:[%s368_s5 + $0x10] sm:$0xff]  ;;  %v108_v17 = vld [vmem:[%s367_s4] sm:$0xff] }
   0x6   :  { %228 = vmatmul.msk.f32.vlgmr.msra.gmra.mxu0 %vm58_vm0, %v28_v7  ;;  %114 = vperm.xlu2 %245, %v108_v17   ;;  %v109_v19 = vld [vmem:[%s367_s4 + $0x8] sm:$0xff]  ;;  %v178_v23 = vld [vmem:[%s368_s5] sm:$0xff]  ;;  %v181_v31 = vld [vmem:[%s368_s5 + $0x18] sm:$0xff] }
   0x7   :  { %v104_v37 = vld [vmem:[%s369_s3] sm:$0xff]  ;;  %v106_v38 = vld [vmem:[%s369_s3 + $0x10] sm:$0xff]  ;;  %v105_v39 = vld [vmem:[%s369_s3 + $0x8] sm:$0xff] }
   0x8   :  { %v107_v40 = vld [vmem:[%s369_s3 + $0x18] sm:$0xff] }
   0x9   :  { %v215_v16 = vld [vmem:[#allocation2] sm:$0x1] }
   0xa   :  { %50 = vperm.xlu0 %243, %v36_v8  }
   0xc   :  { %40 = vperm.xlu1 %244, %v34_v9  }
   0xd   :  { %230 = vmatmul.msk.f32.gmra.mxu3 %vm58_vm0, %v30_v10 }
   0xe   :  { %119 = vperm.xlu2 %245, %v109_v19  }
  0x12   :  { %124 = vperm.xlu0 %243, %v110_v11  }
  0x14   :  { %129 = vperm.xlu1 %244, %v111_v12  }
  0x15   :  { %231 = vmatmul.msk.f32.gmra.mxu3 %vm58_vm0, %v31_v13 }
  0x16   :  { %184 = vperm.xlu2 %245, %v178_v23  }
  0x1a   :  { %189 = vperm.xlu0 %243, %v179_v14  }
  0x1c   :  { %194 = vperm.xlu1 %244, %v180_v15  }
  0x1e   :  { %199 = vperm.xlu2 %245, %v181_v31  }
  0x22   :  { %218 = vperm.xlu0 %243, %v215_v16  }
  0x60   :  { %v115_v41 = vpop.permute.xlu2 %114 }
  0x68   :  { %v120_v42 = vpop.permute.xlu2 %119 }
  0x70   :  { %v185_v48 = vpop.permute.xlu2 %184 }
  0x74   :  { %v56_v20 = vpop.permute.xlu0 %55 }
  0x76   :  { %v46_v22 = vpop.permute.xlu1 %45 }
  0x78   :  { %v200_v0 = vpop.permute.xlu2 %199 }
  0x7c   :  { %v51_v24 = vpop.permute.xlu0 %50 }
  0x7e   :  { %v41_v32 = vpop.permute.xlu1 %40 }
  0x83   :  { %v88_v28 = vpop.f32.mrf.mxu0 }
  0x84   :  { %v89_v34 = vadd.f32 %v88_v28, %v41_v32  ;;  %v125_v44 = vpop.permute.xlu0 %124 }
  0x86   :  { %v100_v36 = vmax.f32 %v89_v34, 0.0  ;;  %v130_v46 = vpop.permute.xlu1 %129 }
  0x88   :  { %v91_v18 = vpop.f32.mrf.mxu3 }
  0x89   :  { %v92_v29 = vadd.f32 %v91_v18, %v46_v22 }
  0x8b   :  { %v101_v35 = vmax.f32 %v92_v29, 0.0 }
  0x8c   :  { %v190_v54 = vpop.permute.xlu0 %189 }
  0x8e   :  { %v195_v61 = vpop.permute.xlu1 %194 }
  0x90   :  { %v94_v21 = vpop.f32.mrf.mxu3 }
  0x91   :  { %v95_v26 = vadd.f32 %v94_v21, %v51_v24 }
  0x93   :  { %v102_v33 = vmax.f32 %v95_v26, 0.0 }
  0x94   :  { %v219_v8 = vpop.permute.xlu0 %218 }
  0x95   :  { %v221_v10 = vperm.slane %v219_v8, 0 }
  0x98   :  { %v97_v25 = vpop.f32.mrf.mxu3 }
  0x99   :  { %v98_v27 = vadd.f32 %v97_v25, %v56_v20 }
  0x9b   :  { %v103_v30 = vmax.f32 %v98_v27, 0.0 }
  0x9d   :  { %157 = vmatpush.msra.mxu1 %v103_v30  ;;  %238 = vmatpush.msra.mxu2 %v103_v30 }
  0x9f   :  { %158 = vmatpush.msra.mxu1 %v102_v33  ;;  %239 = vmatpush.msra.mxu2 %v102_v33 }
  0xa1   :  { %159 = vmatpush.msra.mxu1 %v101_v35  ;;  %240 = vmatpush.msra.mxu2 %v101_v35 }
  0xa3   :  { %160 = vmatpush.msra.mxu1 %v100_v36  ;;  %241 = vmatpush.msra.mxu2 %v100_v36 }
  0xa4   :  { %232 = vmatmul.msk.f32.vlgmr.msra.gmra.mxu1 %vm132_vm1, %v104_v37  ;;  %234 = vmatmul.msk.f32.vlgmr.msra.gmra.mxu2 %vm132_vm1, %v106_v38 }
  0xac   :  { %233 = vmatmul.msk.f32.gmra.mxu1 %vm132_vm1, %v105_v39  ;;  %235 = vmatmul.msk.f32.gmra.mxu2 %vm132_vm1, %v107_v40 }
 0x121   :  { %v162_v43 = vpop.f32.mrf.mxu1 }
 0x122   :  { %v163_v45 = vadd.f32 %v162_v43, %v115_v41 }
 0x124   :  { %v174_v50 = vmax.f32 %v163_v45, 0.0 }
 0x126   :  { %v202_v55 = vmul.f32 %v185_v48, %v174_v50 }
 0x127   :  { %v168_v47 = vpop.f32.mrf.mxu2 }
 0x128   :  { %v169_v51 = vadd.f32 %v168_v47, %v125_v44 }
 0x129   :  { %v165_v49 = vpop.f32.mrf.mxu1 }
 0x12a   :  { %v166_v52 = vadd.f32 %v165_v49, %v120_v42  ;;  %v176_v56 = vmax.f32 %v169_v51, 0.0 }
 0x12c   :  { %v175_v53 = vmax.f32 %v166_v52, 0.0  ;;  %v204_v62 = vmul.f32 %v195_v61, %v176_v56 }
 0x12e   :  { %v203_v57 = vmul.f32 %v190_v54, %v175_v53 }
 0x12f   :  { %v171_v58 = vpop.f32.mrf.mxu2 }
 0x130   :  { %v206_v59 = vadd.f32 %v203_v57, %v202_v55  ;;  %v172_v60 = vadd.f32 %v171_v58, %v130_v46 }
 0x132   :  { %v177_v63 = vmax.f32 %v172_v60, 0.0  ;;  %v207_v2 = vadd.f32 %v206_v59, %v204_v62 }
 0x134   :  { %v205_v1 = vmul.f32 %v200_v0, %v177_v63 }
 0x136   :  { %v208_v3 = vadd.f32 %v207_v2, %v205_v1 }
 0x138   :  { %v209_v4 = vrot.slane %v208_v3, 4 }
 0x13a   :  { %v210_v5 = vadd.f32 %v209_v4, %v208_v3 }
 0x13c   :  { %v211_v6 = vrot.slane %v210_v5, 2 }
 0x13e   :  { %v212_v7 = vadd.f32 %v211_v6, %v210_v5 }
 0x140   :  { %v213_v9 = vrot.slane %v212_v7, 1 }
 0x142   :  { %v214_v11 = vadd.f32 %v213_v9, %v212_v7 }
 0x144   :  { %v222_v12 = vadd.f32 %v221_v10, %v214_v11 }
 0x146   :  { %223 = vst [vmem:[%s370_s7] sm:$0x1] %v222_v12 }

</bundles_post_ra>
